<compile_context>
chip_gen: v6e
topology: v6e:2x2x1
jax: 0.10.0
libtpu: 0.0.40
codegen_flags: <defaults>
</compile_context>

<pallas_src>
import functools

import jax
import jax.numpy as jnp
from jax.experimental import pallas as pl
from jax.experimental.pallas import tpu as pltpu


def _linear_kernel(x_ref, w_ref, b_ref, o_ref):
    # x_ref: (Bp, D_in) f32   w_ref: (D_in, TN) bf16
    # b_ref: (1, TN)    f32   o_ref: (Bp, TN)   f32
    # bf16 x bf16 on the MXU with f32 accumulation; bias added in f32.
    x_bf = x_ref[...].astype(jnp.bfloat16)
    acc = jnp.dot(x_bf, w_ref[...], preferred_element_type=jnp.float32)
    o_ref[...] = (acc + b_ref[...]).astype(o_ref.dtype)


# Conservative per-buffer VMEM budget so double-buffered tiles fit even on
# v7x (64 MiB physical / 32 MiB default scoped VMEM per TensorCore).
_VMEM_TILE_BUDGET_BYTES = 8 * 1024 * 1024


def _pick_tn(d_in, b_pad, d_out):
    """Largest lane-aligned N-tile that fits the (double-buffered) budget."""
    for tn in (2048, 1024, 512, 256, 128):
        if d_out % tn != 0:
            continue
        per_tile = d_in * tn * 2 + b_pad * tn * 4 + tn * 4  # w(bf16)+out+bias
        if 2 * per_tile <= _VMEM_TILE_BUDGET_BYTES:          # x2 for double-buffer
            return tn
    # Fallback: full-extent block (block == array dim is always legal).
    return d_out


def structure_decoder_forward(global_latent, weight_t_bf16, bias, num_layers):
    """Pallas implementation of StructureDecoder.forward.

    Args:
      global_latent:  (B, D_in) or (D_in,) float32.
      weight_t_bf16:  (D_in, num_layers * layer_dim) bfloat16
                      (PyTorch weight, transposed + cast ONCE at setup).
      bias:           (num_layers * layer_dim,) float32.
      num_layers:     int.

    Returns:
      (B, num_layers, layer_dim) float32.
    """
    if global_latent.ndim == 1:
        global_latent = global_latent[None, :]
    b, d_in = global_latent.shape
    d_out = weight_t_bf16.shape[1]

    # Pad rows to a multiple of 8 sublanes (avoids masked sublane stores and
    # amortizes the weight stream over a fuller MXU M-tile).
    b_pad = max(8, ((b + 7) // 8) * 8)
    x = jnp.pad(global_latent, ((0, b_pad - b), (0, 0)))
    bias2d = bias.reshape(1, d_out)

    tn = _pick_tn(d_in, b_pad, d_out)
    n_tiles = pl.cdiv(d_out, tn)

    cost = pl.CostEstimate(
        flops=2 * b_pad * d_in * d_out,
        transcendentals=0,
        bytes_accessed=(weight_t_bf16.size * 2      # bf16 weight (dominant)
                        + x.size * 4 + bias.size * 4 + b_pad * d_out * 4),
    )

    out = pl.pallas_call(
        _linear_kernel,
        out_shape=jax.ShapeDtypeStruct((b_pad, d_out), jnp.float32),
        grid_spec=pltpu.PrefetchScalarGridSpec(
            num_scalar_prefetch=0,
            grid=(n_tiles,),
            in_specs=[
                # x: grid-invariant, stays resident in VMEM.
                pl.BlockSpec((b_pad, d_in), lambda j: (0, 0)),
                # Weight: streamed column-tile by column-tile (double-buffered).
                pl.BlockSpec((d_in, tn), lambda j: (0, j)),
                pl.BlockSpec((1, tn), lambda j: (0, j)),
            ],
            out_specs=pl.BlockSpec((b_pad, tn), lambda j: (0, j)),
        ),
        compiler_params=pltpu.CompilerParams(
            # Column tiles are independent -> v7x's 2 TCs can split them;
            # near-zero cost on v5e/v6e.
            dimension_semantics=("parallel",),
            vmem_limit_bytes=32 * 1024 * 1024,
        ),
        cost_estimate=cost,
    )(x, weight_t_bf16, bias2d)

    # Keep the lane-dense (B, d_out) slab as long as possible; the
    # lane-sparse (num_layers, layer_dim=16) view is only materialized here
    # because the module contract returns 3-D.
    layer_dim = d_out // num_layers
    return out[:b].reshape(b, num_layers, layer_dim)


if __name__ == "__main__":
    # Small shapes consistent with the module.
    batch = 2
    global_latent_dim = 32
    layer_embedding_dim = 16
    num_layers = 32
    d_out = num_layers * layer_embedding_dim  # 512

    key = jax.random.PRNGKey(0)
    k_x, k_w, k_b = jax.random.split(key, 3)

    # Deterministic parameter init (mimic nn.Linear default U(-1/sqrt(fan_in), +)).
    bound = 1.0 / (global_latent_dim ** 0.5)
    weight = jax.random.uniform(k_w, (d_out, global_latent_dim),
                                minval=-bound, maxval=bound, dtype=jnp.float32)
    bias = jax.random.uniform(k_b, (d_out,),
                              minval=-bound, maxval=bound, dtype=jnp.float32)

    # Transpose + bf16-cast materialized ONCE at parameter setup (not per step).
    weight_t_bf16 = jnp.asarray(weight.T, dtype=jnp.bfloat16)

    global_latent = jax.random.normal(k_x, (batch, global_latent_dim),
                                      dtype=jnp.float32)

    fwd = jax.jit(functools.partial(structure_decoder_forward,
                                    num_layers=num_layers))
    layer_latents = fwd(global_latent, weight_t_bf16, bias)
    layer_latents = jax.block_until_ready(layer_latents)

    # Reference in plain JAX, matching the kernel's bf16-operand / f32-acc math.
    x_bf = global_latent.astype(jnp.bfloat16).astype(jnp.float32)
    w_f32 = weight_t_bf16.astype(jnp.float32)
    ref = (x_bf @ w_f32 + bias).reshape(batch, num_layers, layer_embedding_dim)

    assert layer_latents.shape == (batch, num_layers, layer_embedding_dim)
    assert jnp.allclose(layer_latents, ref, atol=1e-4, rtol=1e-4)

    print("KERNEL_OK")
</pallas_src>

<mosaic_0001>
module attributes {stable_mosaic.version = 11 : i64} {
  func.func @_linear_kernel(%arg0: i32, %arg1: memref<8x32xf32, #tpu.memory_space<vmem>>, %arg2: memref<32x512xbf16, #tpu.memory_space<vmem>>, %arg3: memref<1x512xf32, #tpu.memory_space<vmem>>, %arg4: memref<8x512xf32, #tpu.memory_space<vmem>>) attributes {dimension_semantics = [#tpu.dimension_semantics<parallel>], iteration_bounds = array<i64: 1>, scalar_prefetch = 0 : i64, scratch_operands = 0 : i64, tpu.core_type = #tpu.core_type<tc>, window_params = [{pipeline_mode = #tpu.pipeline_mode<synchronous>, transform_indices = @transform_0, window_bounds = array<i64: 8, 32>}, {transform_indices = @transform_1, window_bounds = array<i64: 32, 512>}, {transform_indices = @transform_2, window_bounds = array<i64: 1, 512>}, {transform_indices = @transform_3, window_bounds = array<i64: 8, 512>}]} {
    %c0 = arith.constant 0 : index
    %c0_0 = arith.constant 0 : index
    %0 = vector.load %arg1[%c0, %c0_0] : memref<8x32xf32, #tpu.memory_space<vmem>>, vector<8x32xf32>
    %1 = arith.truncf %0 : vector<8x32xf32> to vector<8x32xbf16>
    %c0_1 = arith.constant 0 : index
    %c0_2 = arith.constant 0 : index
    %2 = vector.load %arg2[%c0_1, %c0_2] : memref<32x512xbf16, #tpu.memory_space<vmem>>, vector<32x512xbf16>
    %cst = arith.constant dense<0.000000e+00> : vector<8x512xf32>
    %3 = tpu.matmul %1, %2, %cst {dimension_numbers = #tpu.dot_dimension_numbers<[1], [0], [0], [1], [0, 0, 1, 1], [], []>} : vector<8x32xbf16>, vector<32x512xbf16>, vector<8x512xf32> -> vector<8x512xf32>
    %c0_3 = arith.constant 0 : index
    %c0_4 = arith.constant 0 : index
    %4 = vector.load %arg3[%c0_3, %c0_4] : memref<1x512xf32, #tpu.memory_space<vmem>>, vector<1x512xf32>
    %5 = vector.broadcast %4 : vector<1x512xf32> to vector<8x512xf32>
    %6 = arith.addf %3, %5 : vector<8x512xf32>
    %c0_5 = arith.constant 0 : index
    %c0_6 = arith.constant 0 : index
    %7 = vector.load %arg4[%c0_5, %c0_6] : memref<8x512xf32, #tpu.memory_space<vmem>>, vector<8x512xf32>
    tpu.vector_store %arg4[%c0_5, %c0_6], %6 {strides = array<i32>} : memref<8x512xf32, #tpu.memory_space<vmem>>, vector<8x512xf32>,
    return
  }
  func.func @transform_0(%arg0: i32) -> (i32, i32) {
    %c0_i32 = arith.constant 0 : i32
    %c0_i32_0 = arith.constant 0 : i32
    %c0_i32_1 = arith.constant 0 : i32
    return %c0_i32, %c0_i32_0 : i32, i32
  }
  func.func @transform_1(%arg0: i32) -> (i32, i32) {
    %c0_i32 = arith.constant 0 : i32
    %c0_i32_0 = arith.constant 0 : i32
    return %c0_i32, %arg0 : i32, i32
  }
  func.func @transform_2(%arg0: i32) -> (i32, i32) {
    %c0_i32 = arith.constant 0 : i32
    %c0_i32_0 = arith.constant 0 : i32
    return %c0_i32, %arg0 : i32, i32
  }
  func.func @transform_3(%arg0: i32) -> (i32, i32) {
    %c0_i32 = arith.constant 0 : i32
    %c0_i32_0 = arith.constant 0 : i32
    return %c0_i32, %arg0 : i32, i32
  }
}

</mosaic_0001>

<bundles_post_ra>
// kernel: structure_decoder_forward.1
= control target key start
LH: loop header
LB: loop body
LE: loop exit
PB: predicated region body
PF: predicated region fallthrough
CT: control target
= control target key end

     0   :  { %8 = vsyncpa [#allocation3], 0  ;;  %s244_s12 = smov [#allocation2]   ;;  %s289_s0 = inlined_call_operand.vmem [shape: f32[8,32], index: 0, kind: input, shape index: {}]   ;;  %s290_s1 = inlined_call_operand.hbm [shape: bf16[32,512], index: 1, kind: input, shape index: {}]   ;;  %s291_s2 = inlined_call_operand.vmem [shape: f32[1,512], index: 2, kind: input, shape index: {}]   ;;  %s292_s3 = inlined_call_operand.vmem [shape: f32[8,512], index: 3, kind: output, shape index: {}]  }
   0x1   :  { %s16_s13 = sshll.u32 %s244_s12, 4  ;;  %s17_s13 = int_to_ptr.vmem [resolvable:$true] %s16_s13 }
   0x2   :  { %s230_s14 = scalar_lea.vmem %s17_s13, 1024  ;;  %p235_p1 = scmp.lt.s32.totalorder %s17_s13, %s17_s13 }
   0x3   :  { %p231_p0 = scmp.ne.s32.totalorder %s17_s13, %s230_s14  ;;  %p236_p2 = scmp.lt.s32.totalorder %s230_s14, %s230_s14 }
   0x5   :  { %p237_p3 = por %p236_p2, %p235_p1 }
   0x7   :  { %p238_p4 = pnand %p237_p3, %p231_p0 }
   0x9   :  { %241 = shalt.err (!%p238_p4)
}
   0xa   :  { %s245_s15 = smov 256   ;;  %s246_s16 = smov 16  }
   0xb   :  { %22 = dma.hbm_to_vmem [thread:$0]  %s290_s1, 1024, %s17_s13, [#allocation3], %s245_s15, %s245_s15, %s246_s16  }
   0xc   :  { %242 = dma.done.wait [#allocation3], 1024  }
   0xd   :  { %243 = vsyncadd [#allocation3], 4294966272  ;;  %v247_v0 = vmov 0   ;;  %v210_v1 = vld [vmem:[#allocation2 + $0x24] ss:$16 sps:$4 sm:$0xff]   ;;  %vm101_vm0 = vcmask 261120   ;;  %v41_v11 = vlaneseq }
   0xe   :  { %137 = vmatprep.mubr.bf16.mxu0 %v247_v0  ;;  %178 = vmatprep.mubr.bf16.mxu1 %v247_v0  ;;  %v212_v2 = vld [vmem:[#allocation2 + $0x2c] ss:$16 sps:$4 sm:$0xff]   ;;  %v214_v3 = vld [vmem:[#allocation2 + $0x20] ss:$16 sps:$4 sm:$0xff]   ;;  %v215_v4 = vld [vmem:[#allocation2 + $0x28] ss:$16 sps:$4 sm:$0xff]  }
   0xf   :  { %117 = vmatprep.subr.bf16.mxu0 %v210_v1  ;;  %158 = vmatprep.subr.bf16.mxu1 %v212_v2  ;;  %v216_v5 = vld [vmem:[#allocation2 + $0x4] ss:$16 sps:$4 sm:$0xff]   ;;  %v218_v6 = vld [vmem:[#allocation2 + $0xc] ss:$16 sps:$4 sm:$0xff]   ;;  %v220_v7 = vld [vmem:[#allocation2] ss:$16 sps:$4 sm:$0xff]  }
  0x10   :  { %118 = vmatpush1.bf16.msra.mxu0 %v214_v3  ;;  %159 = vmatpush1.bf16.msra.mxu1 %v215_v4  ;;  %v221_v8 = vld [vmem:[#allocation2 + $0x8] ss:$16 sps:$4 sm:$0xff]   ;;  %v29_v9 = vld [vmem:[%s289_s0] sm:$0xff]  ;;  %v42_v12 = vshrl.u32 %v41_v11, 7 }
  0x11   :  { %119 = vmatprep.subr.bf16.mxu0 %v216_v5  ;;  %160 = vmatprep.subr.bf16.mxu1 %v218_v6  ;;  %v30_v10 = vpack.c.bf16 %v29_v9, %v29_v9  ;;  %v39_v15 = vld [vmem:[%s291_s2] sm:$0xf] }
  0x12   :  { %v43_v13 = vsub.s32 0, %v42_v12  ;;  %v51_v14 = vsub.s32 2, %v42_v12  ;;  %v47_v16 = vsub.s32 1, %v42_v12  ;;  %v55_v17 = vsub.s32 3, %v42_v12 }
  0x14   :  { %120 = vmatpush1.bf16.msra.mxu0 %v220_v7  ;;  %161 = vmatpush1.bf16.msra.mxu1 %v221_v8  ;;  %v44_v18 = vrot.slane %v39_v15, %v43_v13  ;;  %v52_v19 = vrot.slane %v39_v15, %v51_v14  ;;  %v48_v20 = vrot.slane %v39_v15, %v47_v16 }
  0x15   :  { %v56_v21 = vrot.slane %v39_v15, %v55_v17 }
  0x17   :  { %204 = vmatmul.mubr.msk.bf16.vlgmr.msra.gmra.mxu0 %vm101_vm0, %v30_v10  ;;  %205 = vmatmul.mubr.msk.bf16.vlgmr.msra.gmra.mxu1 %vm101_vm0, %v30_v10 }
  0xd7   :  { %v139_v22 = vpop.f32.mrf.mxu0  ;;  %v180_v23 = vpop.f32.mrf.mxu1 }
  0xd8   :  { %v140_v24 = vadd.f32 %v139_v22, %v44_v18  ;;  %v181_v25 = vadd.f32 %v180_v23, %v52_v19 }
  0xd9   :  { %v141_v26 = vpop.f32.mrf.mxu0  ;;  %v182_v27 = vpop.f32.mrf.mxu1 }
  0xda   :  { %187 = vst [vmem:[%s292_s3] sm:$0xff] %v140_v24  ;;  %189 = vst [vmem:[%s292_s3 + $0x10] sm:$0xff] %v181_v25  ;;  %v142_v28 = vadd.f32 %v141_v26, %v48_v20  ;;  %v183_v29 = vadd.f32 %v182_v27, %v56_v21 }
  0xdb   :  { %v143_v30 = vpop.f32.mrf.mxu0  ;;  %v184_v31 = vpop.f32.mrf.mxu1 }
  0xdc   :  { %188 = vst [vmem:[%s292_s3 + $0x8] sm:$0xff] %v142_v28  ;;  %190 = vst [vmem:[%s292_s3 + $0x18] sm:$0xff] %v183_v29 }
  0xdd   :  { %v144_v32 = vpop.f32.mrf.mxu0  ;;  %v185_v33 = vpop.f32.mrf.mxu1 }
  0xde   :  { %195 = vsyncpa [#allocation3], 1 }

</bundles_post_ra>
